<compile_context>
chip_gen: v7x
topology: tpu7x:2x2x1
jax: 0.10.0
libtpu: 0.0.40
codegen_flags: <defaults>
</compile_context>

<pallas_src>
import functools

import jax
import jax.numpy as jnp
from jax.experimental import pallas as pl
from jax.experimental.pallas import tpu as pltpu


def _sqdiff_sum_kernel(d1_ref, d2_ref, out_ref, acc_ref, *, rows, tile_r):
    """Accumulates sum((d1 - d2)^2) over the (single, reduction) grid axis."""
    t = pl.program_id(0)

    @pl.when(t == 0)
    def _():
        acc_ref[...] = jnp.zeros_like(acc_ref)

    d1 = d1_ref[...].astype(jnp.float32)
    d2 = d2_ref[...].astype(jnp.float32)
    diff = d1 - d2
    sq = diff * diff

    # Static check: only emit the mask when the last block is partial.  The
    # OOB rows of a partial block are unspecified (possibly stale VMEM), so
    # they must be zeroed before accumulation.
    if rows % tile_r != 0:
        valid = rows - t * tile_r                       # >= tile_r except last block
        row_idx = jax.lax.broadcasted_iota(jnp.int32, sq.shape, 0)
        sq = jnp.where(row_idx < valid, sq, 0.0)

    # Sublane-reduced partial: (1, lanes) accumulator.  Extra VPU/XLU adds are
    # hidden under the HBM DMA; VMEM saved goes into bigger input blocks.
    acc_ref[...] += jnp.sum(sq, axis=0, keepdims=True)

    @pl.when(t == pl.num_programs(0) - 1)
    def _():
        # Single cross-lane reduce of (1, lanes), paid once at the end.
        out_ref[...] = jnp.sum(acc_ref[...])[None, None].astype(out_ref.dtype)


def _default_tiling():
    """Pick (row_tile, vmem_limit_bytes) from the chip's VMEM capacity."""
    row_tile, vmem_limit = 2048, 32 * 1024 * 1024       # safe on v7x (64 MiB VMEM)
    try:
        info = pltpu.get_tpu_info()
        if getattr(info, "vmem_capacity_bytes", 0) >= 100 * 1024 * 1024:
            row_tile, vmem_limit = 4096, 64 * 1024 * 1024   # v5e / v6e: 128 MiB VMEM
    except Exception:  # query unavailable -> keep the conservative default
        pass
    return row_tile, vmem_limit


def emask_loss(d_1, d_2, *, lanes=512, row_tile=None, small_n_threshold=1 << 20):
    """Computes (d_1 - d_2).norm(p=2) with a Pallas TPU kernel."""
    d_1 = jnp.asarray(d_1)
    d_2 = jnp.asarray(d_2)
    assert d_1.shape == d_2.shape, (d_1.shape, d_2.shape)
    assert lanes % 128 == 0, lanes
    n = int(d_1.size)

    # Small-input fast path: launch/reshape/grid overhead dominates below ~1M
    # elements; a single fused XLA reduction is strictly faster there.
    if n < small_n_threshold or n < lanes:
        diff = d_1.astype(jnp.float32) - d_2.astype(jnp.float32)
        return jnp.sqrt(jnp.sum(diff * diff))

    if row_tile is None:
        row_tile, vmem_limit = _default_tiling()
    else:
        _, vmem_limit = _default_tiling()

    d1f = d_1.reshape(-1)
    d2f = d_2.reshape(-1)

    # --- lane-dense repack with NO padding copy -----------------------------
    # Prefer a lane width that divides n so the reshape is a free bitcast.
    lanes_ = next((c for c in (lanes, 256, 128) if n % c == 0), None)
    if lanes_ is None:
        # Ragged size: kernel handles the largest lanes-multiple prefix; the
        # tail (< lanes elements) is folded into the final reduction in JAX.
        lanes_ = lanes
        n_main = (n // lanes_) * lanes_
    else:
        n_main = n
    rem = n - n_main

    rows = n_main // lanes_
    if rows <= row_tile:
        tile_r = rows                       # full-array block (no (8,128) constraint)
    else:
        # Keep the row tile a multiple of the dtype's minimum sublane tiling.
        min_rows = {4: 8, 2: 16, 1: 32}.get(d_1.dtype.itemsize, 8)
        tile_r = max(min_rows, (row_tile // min_rows) * min_rows)
    n_tiles = pl.cdiv(rows, tile_r)

    if rem:
        d1_2d = d1f[:n_main].reshape(rows, lanes_)
        d2_2d = d2f[:n_main].reshape(rows, lanes_)
    else:
        d1_2d = d1f.reshape(rows, lanes_)   # free bitcast, no HBM traffic
        d2_2d = d2f.reshape(rows, lanes_)

    in_spec = pl.BlockSpec((tile_r, lanes_), lambda t: (t, 0))

    ssq = pl.pallas_call(
        functools.partial(_sqdiff_sum_kernel, rows=rows, tile_r=tile_r),
        out_shape=jax.ShapeDtypeStruct((1, 1), jnp.float32),
        grid_spec=pltpu.PrefetchScalarGridSpec(
            num_scalar_prefetch=0,
            grid=(n_tiles,),
            in_specs=[in_spec, in_spec],
            out_specs=pl.BlockSpec((1, 1), lambda t: (0, 0)),
            scratch_shapes=[pltpu.VMEM((1, lanes_), jnp.float32)],
        ),
        compiler_params=pltpu.CompilerParams(
            dimension_semantics=("arbitrary",),     # reduction axis
            vmem_limit_bytes=vmem_limit,
        ),
        cost_estimate=pl.CostEstimate(
            flops=3 * n_main,
            transcendentals=0,
            bytes_accessed=2 * n_main * d_1.dtype.itemsize + 4,
        ),
    )(d1_2d, d2_2d)

    total = ssq[0, 0]
    if rem:
        t1 = d1f[n_main:].astype(jnp.float32)
        t2 = d2f[n_main:].astype(jnp.float32)
        total = total + jnp.sum((t1 - t2) * (t1 - t2))
    return jnp.sqrt(total)


if __name__ == "__main__":
    key = jax.random.PRNGKey(0)
    k1, k2, k3, k4, k5, k6 = jax.random.split(key, 6)

    def ref(a, b):
        a = a.astype(jnp.float32)
        b = b.astype(jnp.float32)
        return jnp.sqrt(jnp.sum((a - b) ** 2))

    # 1) Canonical small EMaskLoss input (mask / attribution maps, NCHW).
    d_1 = jax.random.uniform(k1, (2, 4, 16, 16), dtype=jnp.float32)
    d_2 = jax.random.uniform(k2, (2, 4, 16, 16), dtype=jnp.float32)
    out = jax.block_until_ready(emask_loss(d_1, d_2))           # fast path
    assert jnp.allclose(out, ref(d_1, d_2), rtol=1e-5, atol=1e-5), (out, ref(d_1, d_2))

    # 2) Same input forced through the Pallas kernel (single full-array block).
    out = jax.block_until_ready(emask_loss(d_1, d_2, small_n_threshold=0))
    assert jnp.allclose(out, ref(d_1, d_2), rtol=1e-5, atol=1e-5), (out, ref(d_1, d_2))

    # 3) Multi-tile path with a partial (masked) last block: 20480 elems -> 40 rows.
    a = jax.random.normal(k3, (5, 4, 32, 32), dtype=jnp.float32)
    b = jax.random.normal(k4, (5, 4, 32, 32), dtype=jnp.float32)
    out = jax.block_until_ready(emask_loss(a, b, small_n_threshold=0, row_tile=16))
    assert jnp.allclose(out, ref(a, b), rtol=1e-5, atol=1e-5), (out, ref(a, b))

    # 4) Ragged size (1155 elems, not a multiple of 128): kernel prefix + JAX tail.
    a = jax.random.normal(k5, (3, 5, 7, 11), dtype=jnp.float32)
    b = jax.random.normal(k6, (3, 5, 7, 11), dtype=jnp.float32)
    out = jax.block_until_ready(emask_loss(a, b, small_n_threshold=0))
    assert jnp.allclose(out, ref(a, b), rtol=1e-5, atol=1e-5), (out, ref(a, b))

    print("KERNEL_OK")
</pallas_src>

<mosaic_0001>
module attributes {stable_mosaic.version = 11 : i64} {
  func.func @_sqdiff_sum_kernel(%arg0: i32, %arg1: memref<4x512xf32, #tpu.memory_space<vmem>>, %arg2: memref<4x512xf32, #tpu.memory_space<vmem>>, %arg3: memref<1x1xf32, #tpu.memory_space<vmem>>, %arg4: memref<1x512xf32, #tpu.memory_space<vmem>>) attributes {dimension_semantics = [#tpu.dimension_semantics<arbitrary>], iteration_bounds = array<i64: 1>, scalar_prefetch = 0 : i64, scratch_operands = 1 : i64, tpu.core_type = #tpu.core_type<tc>, window_params = [{transform_indices = @transform_0, window_bounds = array<i64: 4, 512>}, {transform_indices = @transform_1, window_bounds = array<i64: 4, 512>}, {pipeline_mode = #tpu.pipeline_mode<synchronous>, transform_indices = @transform_2, window_bounds = array<i64: 1, 1>}]} {
    %c0_i32 = arith.constant 0 : i32
    %0 = arith.cmpi eq, %arg0, %c0_i32 : i32
    %1 = arith.extui %0 : i1 to i32
    %c0_i32_0 = arith.constant 0 : i32
    %2 = arith.cmpi ne, %1, %c0_i32_0 : i32
    scf.if %2 {
      %cst_10 = arith.constant 0.000000e+00 : f32
      %15 = vector.broadcast %cst_10 : f32 to vector<1x512xf32>
      %c0_11 = arith.constant 0 : index
      %c0_12 = arith.constant 0 : index
      %16 = vector.load %arg4[%c0_11, %c0_12] : memref<1x512xf32, #tpu.memory_space<vmem>>, vector<1x512xf32>
      tpu.vector_store %arg4[%c0_11, %c0_12], %15 {strides = array<i32>} : memref<1x512xf32, #tpu.memory_space<vmem>>, vector<1x512xf32>,
    } else {
    }
    %c0 = arith.constant 0 : index
    %c0_1 = arith.constant 0 : index
    %3 = vector.load %arg1[%c0, %c0_1] : memref<4x512xf32, #tpu.memory_space<vmem>>, vector<4x512xf32>
    %c0_2 = arith.constant 0 : index
    %c0_3 = arith.constant 0 : index
    %4 = vector.load %arg2[%c0_2, %c0_3] : memref<4x512xf32, #tpu.memory_space<vmem>>, vector<4x512xf32>
    %5 = arith.subf %3, %4 : vector<4x512xf32>
    %6 = arith.mulf %5, %5 : vector<4x512xf32>
    %c0_4 = arith.constant 0 : index
    %c0_5 = arith.constant 0 : index
    %7 = vector.load %arg4[%c0_4, %c0_5] : memref<1x512xf32, #tpu.memory_space<vmem>>, vector<1x512xf32>
    %cst = arith.constant dense<0.000000e+00> : vector<512xf32>
    %8 = vector.multi_reduction <add>, %6, %cst [0] : vector<4x512xf32> to vector<512xf32>
    %9 = vector.shape_cast %8 : vector<512xf32> to vector<1x512xf32>
    %10 = arith.addf %7, %9 : vector<1x512xf32>
    %c0_6 = arith.constant 0 : index
    %c0_7 = arith.constant 0 : index
    %11 = vector.load %arg4[%c0_6, %c0_7] : memref<1x512xf32, #tpu.memory_space<vmem>>, vector<1x512xf32>
    tpu.vector_store %arg4[%c0_6, %c0_7], %10 {strides = array<i32>} : memref<1x512xf32, #tpu.memory_space<vmem>>, vector<1x512xf32>,
    %c0_i32_8 = arith.constant 0 : i32
    %12 = arith.cmpi eq, %arg0, %c0_i32_8 : i32
    %13 = arith.extui %12 : i1 to i32
    %c0_i32_9 = arith.constant 0 : i32
    %14 = arith.cmpi ne, %13, %c0_i32_9 : i32
    scf.if %14 {
      %c0_10 = arith.constant 0 : index
      %c0_11 = arith.constant 0 : index
      %15 = vector.load %arg4[%c0_10, %c0_11] : memref<1x512xf32, #tpu.memory_space<vmem>>, vector<1x512xf32>
      %16 = vector.shape_cast %15 : vector<1x512xf32> to vector<1x1x512xf32>
      %cst_12 = arith.constant dense<0.000000e+00> : vector<1xf32>
      %17 = vector.multi_reduction <add>, %16, %cst_12 [1, 2] : vector<1x1x512xf32> to vector<1xf32>
      %18 = vector.shape_cast %17 : vector<1xf32> to vector<1x1x1xf32>
      %19 = vector.extract %18[0, 0, 0] : f32 from vector<1x1x1xf32>
      %20 = vector.broadcast %19 : f32 to vector<1x1xf32>
      %c0_13 = arith.constant 0 : index
      %c0_14 = arith.constant 0 : index
      %21 = vector.load %arg3[%c0_13, %c0_14] : memref<1x1xf32, #tpu.memory_space<vmem>>, vector<1x1xf32>
      tpu.vector_store %arg3[%c0_13, %c0_14], %20 {strides = array<i32>} : memref<1x1xf32, #tpu.memory_space<vmem>>, vector<1x1xf32>,
    } else {
    }
    return
  }
  func.func @transform_0(%arg0: i32) -> (i32, i32) {
    %c0_i32 = arith.constant 0 : i32
    %c0_i32_0 = arith.constant 0 : i32
    return %arg0, %c0_i32 : i32, i32
  }
  func.func @transform_1(%arg0: i32) -> (i32, i32) {
    %c0_i32 = arith.constant 0 : i32
    %c0_i32_0 = arith.constant 0 : i32
    return %arg0, %c0_i32 : i32, i32
  }
  func.func @transform_2(%arg0: i32) -> (i32, i32) {
    %c0_i32 = arith.constant 0 : i32
    %c0_i32_0 = arith.constant 0 : i32
    %c0_i32_1 = arith.constant 0 : i32
    return %c0_i32, %c0_i32_0 : i32, i32
  }
}

</mosaic_0001>

<bundles_post_ra>
// kernel: tpu_custom_call.1
= control target key start
LH: loop header
LB: loop body
LE: loop exit
PB: predicated region body
PF: predicated region fallthrough
CT: control target
= control target key end

     0   :  { %7 = vsyncpa [#allocation4], 0  ;;  %s328_s0 = inlined_call_operand.hbm [shape: f32[4,512], index: 0, kind: input, shape index: {}]   ;;  %s329_s1 = inlined_call_operand.hbm [shape: f32[4,512], index: 1, kind: input, shape index: {}]   ;;  %s330_s2 = inlined_call_operand.hbm [shape: f32[1,1], index: 2, kind: output, shape index: {}]  }
   0x1   :  { %8 = vsyncpa [#allocation7], 0 }
   0x2   :  { %9 = vsyncpa [#allocation5], 0  ;;  %s264_s9 = smov [#allocation3]   ;;  %s265_s11 = smov [#allocation6]  }
   0x3   :  { %s16_s10 = sshll.u32 %s264_s9, 4  ;;  %s26_s12 = sshll.u32 %s265_s11, 4  ;;  %s17_s10 = int_to_ptr.vmem [resolvable:$true] %s16_s10  ;;  %s27_s12 = int_to_ptr.vmem [resolvable:$true] %s26_s12 }
   0x4   :  { %s192_s15 = scalar_lea.hbm %s328_s0, 256 }
   0x5   :  { %p193_p0 = scmp.ne.s32.totalorder %s328_s0, %s192_s15  ;;  %p196_p1 = scmp.lt.u32.totalorder %s192_s15, %s328_s0 }
   0x7   :  { %p198_p2 = pnand %p196_p1, %p193_p0 }
   0x9   :  { %201 = shalt.err (!%p198_p2)
}
   0xa   :  { %s202_s20 = scalar_lea.vmem %s17_s10, 256  ;;  %p207_p4 = scmp.lt.s32.totalorder %s17_s10, %s17_s10 }
   0xb   :  { %p203_p3 = scmp.ne.s32.totalorder %s17_s10, %s202_s20  ;;  %p208_p5 = scmp.lt.s32.totalorder %s202_s20, %s202_s20 }
   0xd   :  { %p209_p6 = por %p208_p5, %p207_p4 }
   0xf   :  { %p210_p7 = pnand %p209_p6, %p203_p3 }
  0x11   :  { %213 = shalt.err (!%p210_p7)
}
  0x12   :  { %19 = dma.hbm_to_vmem [thread:$0]  %s328_s0, 256, %s17_s10, [#allocation4]  }
  0x13   :  { %s214_s25 = scalar_lea.hbm %s329_s1, 256 }
  0x14   :  { %p215_p8 = scmp.ne.s32.totalorder %s329_s1, %s214_s25  ;;  %p218_p9 = scmp.lt.u32.totalorder %s214_s25, %s329_s1 }
  0x16   :  { %p220_p10 = pnand %p218_p9, %p215_p8 }
  0x18   :  { %223 = shalt.err (!%p220_p10)
}
  0x19   :  { %s224_s30 = scalar_lea.vmem %s27_s12, 256  ;;  %p229_p12 = scmp.lt.s32.totalorder %s27_s12, %s27_s12 }
  0x1a   :  { %p225_p11 = scmp.ne.s32.totalorder %s27_s12, %s224_s30  ;;  %p230_p13 = scmp.lt.s32.totalorder %s224_s30, %s224_s30 }
  0x1c   :  { %p231_p0 = por %p230_p13, %p229_p12 }
  0x1e   :  { %p232_p1 = pnand %p231_p0, %p225_p11 }
  0x20   :  { %235 = shalt.err (!%p232_p1)
}
  0x21   :  { %29 = dma.hbm_to_vmem [thread:$0]  %s329_s1, 256, %s27_s12, [#allocation7]  }
  0x22   :  { %258 = dma.done.wait [#allocation4], 256  }
  0x23   :  { %259 = vsyncadd [#allocation4], 4294967040 }
  0x24   :  { %260 = dma.done.wait [#allocation7], 256  }
  0x25   :  { %261 = vsyncadd [#allocation7], 4294967040  ;;  %v40_v0 = vlaneseq  ;;  %v266_v2 = vmov 0.0   ;;  %v45_v3 = vld [vmem:[#allocation3] sm:$0xff]  ;;  %v46_v4 = vld [vmem:[#allocation3 + $0x8] sm:$0xff]  ;;  %vm60_vm1 = vcmask 1043456  }
  0x26   :  { %v47_v5 = vld [vmem:[#allocation6] sm:$0xff]  ;;  %v48_v6 = vld [vmem:[#allocation6 + $0x8] sm:$0xff]  ;;  %v267_v25 = vmov 1966171168   ;;  %vm149_vm2 = vcmask 1040384   ;;  %s268_s1 = smov [#allocation8]  }
  0x27   :  { %vm308_vm0 = vcmp.lt.s32.totalorder %v40_v0, 512  ;;  %v49_v7 = vsub.f32 %v45_v3, %v47_v5  ;;  %v50_v8 = vsub.f32 %v46_v4, %v48_v6  ;;  %v96_v26 = vunpack.c.l.s4 %v267_v25  ;;  %s175_s4 = sshll.u32 %s268_s1, 4  ;;  %s176_s4 = int_to_ptr.vmem [resolvable:$true] %s175_s4 }
  0x28   :  { %44 = vst.msk [vmem:[#allocation2] sm:$0xf] %vm308_vm0, %v266_v2  ;;  %v99_v36 = vshrl.u32 %v40_v0, 7  ;;  %vm167_vm3 = vcmask 0   ;;  %s236_s6 = scalar_lea.vmem %s176_s4, 16  ;;  %s240_s7 = scalar_lea.vmem %s176_s4, 32 }
  0x29   :  { %v51_v9 = vmul.f32 %v49_v7, %v49_v7  ;;  %v52_v10 = vmul.f32 %v50_v8, %v50_v8  ;;  %v97_v35 = vunpack.c.0.s8 %v96_v26  ;;  %p237_p2 = scmp.ne.s32.totalorder %s176_s4, %s236_s6  ;;  %p241_p3 = scmp.lt.s32.totalorder %s176_s4, %s176_s4 }
  0x2a   :  { %v131_v54 = vsub.s32 0, %v99_v36  ;;  %v135_v55 = vsub.s32 1, %v99_v36  ;;  %v139_v56 = vsub.s32 2, %v99_v36  ;;  %v143_v57 = vsub.s32 3, %v99_v36  ;;  %p242_p4 = scmp.lt.s32.totalorder %s240_s7, %s236_s6 }
  0x2b   :  { %v56_v11 = vcombine.high %v51_v9, %v51_v9  ;;  %v61_v12 = vsel %vm60_vm1, %v51_v9, 0.0  ;;  %v57_v13 = vcombine.high %v52_v10, %v52_v10  ;;  %v75_v15 = vsel %vm60_vm1, %v52_v10, 0.0 }
  0x2c   :  { %v62_v14 = vrot.slane %v61_v12, 4  ;;  %v76_v17 = vrot.slane %v75_v15, 4  ;;  %v100_v44 = vsub.s32 %v97_v35, %v99_v36  ;;  %p243_p5 = por %p242_p4, %p241_p3 }
  0x2d   :  { %v68_v16 = vsel %vm60_vm1, %v56_v11, 0.0  ;;  %v82_v20 = vsel %vm60_vm1, %v57_v13, 0.0 }
  0x2e   :  { %v63_v18 = vadd.f32 %v62_v14, %v61_v12  ;;  %v69_v19 = vrot.slane %v68_v16, 4  ;;  %v77_v21 = vadd.f32 %v76_v17, %v75_v15  ;;  %v83_v22 = vrot.slane %v82_v20, 4  ;;  %p244_p6 = pnand %p243_p5, %p237_p2 }
  0x2f   :  { %v53_v51 = vld [vmem:[#allocation2] sm:$0xf] }
  0x30   :  { %v64_v23 = vrot.slane %v63_v18, 2  ;;  %v70_v24 = vadd.f32 %v69_v19, %v68_v16  ;;  %v78_v27 = vrot.slane %v77_v21, 2  ;;  %v84_v28 = vadd.f32 %v83_v22, %v82_v20 }
  0x32   :  { %v65_v29 = vadd.f32 %v64_v23, %v63_v18  ;;  %v71_v30 = vrot.slane %v70_v24, 2  ;;  %v79_v31 = vadd.f32 %v78_v27, %v77_v21  ;;  %v85_v32 = vrot.slane %v84_v28, 2 }
  0x34   :  { %v66_v33 = vrot.slane %v65_v29, 1  ;;  %v72_v34 = vadd.f32 %v71_v30, %v70_v24  ;;  %v80_v37 = vrot.slane %v79_v31, 1  ;;  %v86_v38 = vadd.f32 %v85_v32, %v84_v28 }
  0x36   :  { %v67_v39 = vadd.f32 %v66_v33, %v65_v29  ;;  %v73_v40 = vrot.slane %v72_v34, 1  ;;  %v81_v41 = vadd.f32 %v80_v37, %v79_v31  ;;  %v87_v42 = vrot.slane %v86_v38, 1 }
  0x38   :  { %v74_v43 = vadd.f32 %v73_v40, %v72_v34  ;;  %v88_v45 = vadd.f32 %v87_v42, %v86_v38 }
  0x3a   :  { %v93_v46 = vcombine.low %v67_v39, %v74_v43  ;;  %v94_v47 = vcombine.low %v81_v41, %v88_v45 }
  0x3c   :  { %v101_v48 = vrot.slane %v93_v46, %v100_v44  ;;  %v108_v49 = vrot.slane %v94_v47, %v100_v44 }
  0x3e   :  { %v109_v50 = vcombine.low %v101_v48, %v108_v49 }
  0x40   :  { %v116_v52 = vrot.slane %v109_v50, %v100_v44 }
  0x42   :  { %v118_v53 = vadd.f32 %v116_v52, %v53_v51 }
  0x44   :  { %123 = vst.msk [vmem:[#allocation2] sm:$0xf] %vm308_vm0, %v118_v53 }
  0x4b   :  { %v127_v58 = vld [vmem:[#allocation2] sm:$0xf] }
  0x4c   :  { %v132_v59 = vrot.slane %v127_v58, %v131_v54  ;;  %v136_v60 = vrot.slane %v127_v58, %v135_v55  ;;  %v140_v61 = vrot.slane %v127_v58, %v139_v56  ;;  %v144_v62 = vrot.slane %v127_v58, %v143_v57 }
  0x4e   :  { %v150_v63 = vsel %vm149_vm2, %v132_v59, 0.0  ;;  %v151_v0 = vsel %vm149_vm2, %v136_v60, 0.0  ;;  %v153_v2 = vsel %vm149_vm2, %v140_v61, 0.0  ;;  %v155_v4 = vsel %vm149_vm2, %v144_v62, 0.0 }
  0x4f   :  { %v152_v3 = vadd.f32 %v151_v0, %v150_v63 }
  0x51   :  { %v154_v5 = vadd.f32 %v153_v2, %v152_v3 }
  0x53   :  { %v156_v6 = vadd.f32 %v155_v4, %v154_v5 }
  0x55   :  { %157 = vadd.xlane.f32.xlu0 %v156_v6 }
  0xe2   :  { %v158_v1 = vpop.xlane.xlu0 %157 }
  0xe3   :  { %v159_v7 = vrot.slane %v158_v1, 4 }
  0xe5   :  { %v160_v8 = vadd.f32 %v159_v7, %v158_v1 }
  0xe7   :  { %v161_v9 = vrot.slane %v160_v8, 2 }
  0xe9   :  { %v162_v10 = vadd.f32 %v161_v9, %v160_v8 }
  0xeb   :  { %v163_v11 = vrot.slane %v162_v10, 1 }
  0xed   :  { %v164_v12 = vadd.f32 %v163_v11, %v162_v10 }
  0xef   :  { %185 = vpush %v164_v12 }
 0x120   :  { %s186_s5 = spop %185 }
 0x121   :  { %v166_v13 = vstv %s186_s5 }
 0x122   :  { %168 = vst.msk [vmem:[#allocation8] sm:$0x1] %vm167_vm3, %v166_v13 }
 0x123   :  { %247 = shalt.err (!%p244_p6)
}
 0x124   :  { %s248_s10 = scalar_lea.hbm %s330_s2, 16 }
 0x125   :  { %p249_p7 = scmp.ne.s32.totalorder %s330_s2, %s248_s10  ;;  %p252_p8 = scmp.lt.u32.totalorder %s248_s10, %s330_s2 }
 0x127   :  { %p254_p9 = pnand %p252_p8, %p249_p7 }
 0x129   :  { %257 = shalt.err (!%p254_p9)
}
 0x12a   :  { %178 = dma.vmem_to_hbm [thread:$0]  %s176_s4, 16, %s330_s2, [#allocation5]  }
 0x12b   :  { %262 = dma.done.wait [#allocation5], 16  }
 0x12c   :  { %263 = vsyncadd [#allocation5], 4294967280 }
 0x12d   :  { %182 = vsyncpa [#allocation4], 1 }
 0x12e   :  { %183 = vsyncpa [#allocation7], 1 }
 0x12f   :  { %184 = vsyncpa [#allocation5], 1 }

</bundles_post_ra>
